<compile_context>
chip_gen: v6e
topology: v6e:2x2x1
jax: 0.10.0
libtpu: 0.0.40
codegen_flags: <defaults>
</compile_context>

<pallas_src>
import functools

import jax
import jax.numpy as jnp
from jax.experimental import pallas as pl
from jax.experimental.pallas import tpu as pltpu

LANE = 128
# Blocks are max_block_groups * 4 KiB regardless of dtype: 512 -> 2 MiB per input
# block (4096 f32 rows / 8192 bf16 rows of 128 lanes).
MAX_BLOCK_GROUPS = 512
# Below this element count a fused XLA subtract-square-reduce beats the several-us
# fixed pallas_call dispatch/DMA-setup cost.
MIN_KERNEL_ELEMS = 64 * 1024
# Leading "parallel" grid axis: shards the tile range across the 2 TensorCores on
# v7x; on 1-core chips (v5e/v6e) the axis just iterates serially at ~zero cost.
NUM_CORE_GROUPS = 2

# Native sublane packing per element size: one "group" = (gran, 128) = 4 KiB = 1 vreg.
_SUBLANE_GRAN = {4: 8, 2: 16, 1: 32}


def _sse_kernel(p_ref, t_ref, o_ref, *, block_groups, num_groups, tiles_per_core,
                may_need_mask):
    """Accumulates sum((p - t)^2) into a per-core-group (gran, 128) f32 output."""
    c = pl.program_id(0)   # core group (parallel axis)
    k = pl.program_id(1)   # tile within this core group's range (reduction axis)

    @pl.when(k == 0)
    def _():
        o_ref[...] = jnp.zeros_like(o_ref)

    # Load in native dtype, widen on the VPU (halves HBM traffic for bf16 inputs).
    p = p_ref[...].astype(jnp.float32)
    t = t_ref[...].astype(jnp.float32)
    d = p - t
    sq = d * d                                    # (block_groups, gran, LANE) f32

    def accumulate(x):
        # Reduce over the untiled group axis only: pure vreg-wise VPU adds into a
        # full-vreg accumulator.  The cross-sublane/cross-lane collapse happens
        # exactly once, in the wrapper.
        o_ref[...] += jnp.sum(x, axis=0)

    if may_need_mask:
        tile_idx = c * tiles_per_core + k         # global (unclamped) tile index
        is_interior = (tile_idx + 1) * block_groups <= num_groups

        @pl.when(is_interior)
        def _():
            accumulate(sq)

        @pl.when(jnp.logical_not(is_interior))
        def _():
            # Edge tile (partial) or duplicated tile (odd tile count split over the
            # core groups, block index clamped in the index_map): zero out every
            # group that falls outside the valid range.
            g = tile_idx * block_groups + jax.lax.broadcasted_iota(
                jnp.int32, sq.shape, 0)
            accumulate(jnp.where(g < num_groups, sq, 0.0))
    else:
        accumulate(sq)


def mse_loss(predictions, targets, *, max_block_groups=MAX_BLOCK_GROUPS,
             min_kernel_elems=MIN_KERNEL_ELEMS):
    """Equivalent of torch.mean((predictions - targets) ** 2)."""
    assert predictions.shape == targets.shape, "shape mismatch"
    n = predictions.size
    if n == 0:
        return jnp.float32(jnp.nan)     # torch.mean over an empty tensor is NaN
    inv_n = 1.0 / n                     # computed in Python float64; f32(n) is inexact for n > 2^24

    p_flat = predictions.reshape(-1)
    t_flat = targets.reshape(-1)

    gran = _SUBLANE_GRAN.get(predictions.dtype.itemsize, 8)
    group_elems = gran * LANE
    num_groups = n // group_elems
    main = num_groups * group_elems

    # Small inputs: a fused XLA subtract-square-reduce is strictly faster than the
    # pallas_call dispatch + DMA setup.
    if n < min_kernel_elems or num_groups == 0:
        d = p_flat.astype(jnp.float32) - t_flat.astype(jnp.float32)
        return jnp.sum(d * d) * jnp.float32(inv_n)

    block_groups = min(max(1, max_block_groups), num_groups)
    num_tiles = pl.cdiv(num_groups, block_groups)
    cores = NUM_CORE_GROUPS if num_tiles >= NUM_CORE_GROUPS else 1
    tiles_per_core = pl.cdiv(num_tiles, cores)
    # Mask only needed if the last tile is partial or a tile is duplicated (odd tile
    # count split across core groups).
    may_need_mask = (num_groups % block_groups != 0) or (
        cores * tiles_per_core != num_tiles)

    ragged = main < n
    if ragged:
        p3 = p_flat[:main].reshape(num_groups, gran, LANE)
        t3 = t_flat[:main].reshape(num_groups, gran, LANE)
    else:
        p3 = p_flat.reshape(num_groups, gran, LANE)
        t3 = t_flat.reshape(num_groups, gran, LANE)

    def in_map(c, k):
        # Clamp so a duplicated trailing tile still addresses a valid block; its
        # contribution is masked to zero inside the kernel.
        return (jnp.minimum(c * tiles_per_core + k, num_tiles - 1), 0, 0)

    kernel = functools.partial(
        _sse_kernel, block_groups=block_groups, num_groups=num_groups,
        tiles_per_core=tiles_per_core, may_need_mask=may_need_mask)

    # TODO(synk): for ragged shapes, a memory_space=pl.ANY + manual-DMA path would
    # avoid relying on allow_input_fusion to elide the prefix-slice copy.
    partial_sums = pl.pallas_call(
        kernel,
        out_shape=jax.ShapeDtypeStruct((cores, gran, LANE), jnp.float32),
        grid_spec=pltpu.PrefetchScalarGridSpec(
            num_scalar_prefetch=0,
            grid=(cores, tiles_per_core),
            in_specs=[
                pl.BlockSpec((block_groups, gran, LANE), in_map),
                pl.BlockSpec((block_groups, gran, LANE), in_map),
            ],
            out_specs=pl.BlockSpec((None, gran, LANE), lambda c, k: (c, 0, 0)),
        ),
        compiler_params=pltpu.CompilerParams(
            dimension_semantics=("parallel", "arbitrary"),
            vmem_limit_bytes=32 * 1024 * 1024,
            allow_input_fusion=[True, True] if ragged else None,
        ),
    )(p3, t3)

    sse = jnp.sum(partial_sums)   # single cross-lane reduce, outside the kernel

    if ragged:                    # flat tail (< gran*128 elements): plain JAX
        tp = p_flat[main:].astype(jnp.float32)
        tt = t_flat[main:].astype(jnp.float32)
        td = tp - tt
        sse = sse + jnp.sum(td * td)

    return sse * jnp.float32(inv_n)


if __name__ == "__main__":
    def _ref(p, t):
        return jnp.mean((p.astype(jnp.float32) - t.astype(jnp.float32)) ** 2)

    key = jax.random.PRNGKey(0)
    kp, kt = jax.random.split(key)

    # 1) Primary case: small 4-D tensors (batch=2, channels=4, spatial=16x16), f32.
    #    min_kernel_elems=0 forces the Pallas path for this small demo shape.
    shape = (2, 4, 16, 16)
    predictions = jax.random.normal(kp, shape, dtype=jnp.float32)
    targets = jax.random.normal(kt, shape, dtype=jnp.float32)
    loss = mse_loss(predictions, targets, min_kernel_elems=0)
    jax.block_until_ready(loss)
    assert jnp.allclose(loss, _ref(predictions, targets), rtol=1e-5, atol=1e-6), (
        loss, _ref(predictions, targets))

    #    Default config on the same inputs: routed through the fused-XLA fallback.
    loss_fb = mse_loss(predictions, targets)
    jax.block_until_ready(loss_fb)
    assert jnp.allclose(loss_fb, _ref(predictions, targets), rtol=1e-5, atol=1e-6), (
        loss_fb, _ref(predictions, targets))

    # 2) Native-dtype path: bf16 inputs (gran=16), widened inside the kernel.
    p_bf = predictions.astype(jnp.bfloat16)
    t_bf = targets.astype(jnp.bfloat16)
    loss_bf = mse_loss(p_bf, t_bf, min_kernel_elems=0)
    jax.block_until_ready(loss_bf)
    assert jnp.allclose(loss_bf, _ref(p_bf, t_bf), rtol=1e-5, atol=1e-6), (
        loss_bf, _ref(p_bf, t_bf))

    # 3) Ragged case: 13*401 = 5213 elements -> 5 full groups + 93-element tail.
    #    max_block_groups=2 -> 3 tiles over 2 core groups: exercises the partial
    #    edge tile, the duplicated (clamped + masked) tile, and the wrapper tail.
    kp2, kt2 = jax.random.split(jax.random.PRNGKey(1))
    pr = jax.random.normal(kp2, (13, 401), dtype=jnp.float32)
    tr = jax.random.normal(kt2, (13, 401), dtype=jnp.float32)
    loss_r = mse_loss(pr, tr, max_block_groups=2, min_kernel_elems=0)
    jax.block_until_ready(loss_r)
    assert jnp.allclose(loss_r, _ref(pr, tr), rtol=1e-5, atol=1e-6), (
        loss_r, _ref(pr, tr))

    # 4) Clean multi-tile / 2-core-group path at a moderate size with the default
    #    element threshold: 16*8*32*32 = 131072 elements = 128 groups.
    kp3, kt3 = jax.random.split(jax.random.PRNGKey(2))
    pm = jax.random.normal(kp3, (16, 8, 32, 32), dtype=jnp.float32)
    tm = jax.random.normal(kt3, (16, 8, 32, 32), dtype=jnp.float32)
    loss_m = mse_loss(pm, tm, max_block_groups=32)
    jax.block_until_ready(loss_m)
    assert jnp.allclose(loss_m, _ref(pm, tm), rtol=1e-5, atol=1e-6), (
        loss_m, _ref(pm, tm))

    print("KERNEL_OK")
</pallas_src>

<mosaic_0001>
module attributes {stable_mosaic.version = 11 : i64} {
  func.func @_sse_kernel(%arg0: i32, %arg1: i32, %arg2: memref<2x8x128xf32, #tpu.memory_space<vmem>>, %arg3: memref<2x8x128xf32, #tpu.memory_space<vmem>>, %arg4: memref<1x8x128xf32, #tpu.memory_space<vmem>>) attributes {dimension_semantics = [#tpu.dimension_semantics<parallel>, #tpu.dimension_semantics<arbitrary>], iteration_bounds = array<i64: 1, 1>, scalar_prefetch = 0 : i64, scratch_operands = 0 : i64, tpu.core_type = #tpu.core_type<tc>, window_params = [{transform_indices = @transform_0, window_bounds = array<i64: 2, 8, 128>}, {transform_indices = @transform_1, window_bounds = array<i64: 2, 8, 128>}, {transform_indices = @transform_2, window_bounds = array<i64: 1, 8, 128>}]} {
    %c0_i32 = arith.constant 0 : i32
    %0 = arith.cmpi eq, %arg1, %c0_i32 : i32
    %1 = arith.extui %0 : i1 to i32
    %c0_i32_0 = arith.constant 0 : i32
    %2 = arith.cmpi ne, %1, %c0_i32_0 : i32
    scf.if %2 {
      %cst_12 = arith.constant 0.000000e+00 : f32
      %14 = vector.broadcast %cst_12 : f32 to vector<8x128xf32>
      %c0_13 = arith.constant 0 : index
      %c0_14 = arith.constant 0 : index
      %c0_15 = arith.constant 0 : index
      %15 = vector.load %arg4[%c0_13, %c0_14, %c0_15] : memref<1x8x128xf32, #tpu.memory_space<vmem>>, vector<1x8x128xf32>
      %16 = vector.shape_cast %15 : vector<1x8x128xf32> to vector<8x128xf32>
      %17 = vector.shape_cast %14 : vector<8x128xf32> to vector<1x8x128xf32>
      tpu.vector_store %arg4[%c0_13, %c0_14, %c0_15], %17 {strides = array<i32>} : memref<1x8x128xf32, #tpu.memory_space<vmem>>, vector<1x8x128xf32>,
    } else {
    }
    %c0 = arith.constant 0 : index
    %c0_1 = arith.constant 0 : index
    %c0_2 = arith.constant 0 : index
    %3 = vector.load %arg2[%c0, %c0_1, %c0_2] : memref<2x8x128xf32, #tpu.memory_space<vmem>>, vector<2x8x128xf32>
    %c0_3 = arith.constant 0 : index
    %c0_4 = arith.constant 0 : index
    %c0_5 = arith.constant 0 : index
    %4 = vector.load %arg3[%c0_3, %c0_4, %c0_5] : memref<2x8x128xf32, #tpu.memory_space<vmem>>, vector<2x8x128xf32>
    %5 = arith.subf %3, %4 : vector<2x8x128xf32>
    %6 = arith.mulf %5, %5 : vector<2x8x128xf32>
    %c0_6 = arith.constant 0 : index
    %c0_7 = arith.constant 0 : index
    %c0_8 = arith.constant 0 : index
    %7 = vector.load %arg4[%c0_6, %c0_7, %c0_8] : memref<1x8x128xf32, #tpu.memory_space<vmem>>, vector<1x8x128xf32>
    %8 = vector.shape_cast %7 : vector<1x8x128xf32> to vector<8x128xf32>
    %cst = arith.constant dense<0.000000e+00> : vector<8x128xf32>
    %9 = vector.multi_reduction <add>, %6, %cst [0] : vector<2x8x128xf32> to vector<8x128xf32>
    %10 = arith.addf %8, %9 : vector<8x128xf32>
    %c0_9 = arith.constant 0 : index
    %c0_10 = arith.constant 0 : index
    %c0_11 = arith.constant 0 : index
    %11 = vector.load %arg4[%c0_9, %c0_10, %c0_11] : memref<1x8x128xf32, #tpu.memory_space<vmem>>, vector<1x8x128xf32>
    %12 = vector.shape_cast %11 : vector<1x8x128xf32> to vector<8x128xf32>
    %13 = vector.shape_cast %10 : vector<8x128xf32> to vector<1x8x128xf32>
    tpu.vector_store %arg4[%c0_9, %c0_10, %c0_11], %13 {strides = array<i32>} : memref<1x8x128xf32, #tpu.memory_space<vmem>>, vector<1x8x128xf32>,
    return
  }
  func.func @transform_0(%arg0: i32, %arg1: i32) -> (i32, i32, i32) {
    %c1_i32 = arith.constant 1 : i32
    %0 = arith.muli %arg0, %c1_i32 : i32
    %1 = arith.addi %0, %arg1 : i32
    %c0_i32 = arith.constant 0 : i32
    %2 = arith.minsi %1, %c0_i32 : i32
    %c0_i32_0 = arith.constant 0 : i32
    %c0_i32_1 = arith.constant 0 : i32
    %c0_i32_2 = arith.constant 0 : i32
    return %2, %c0_i32_0, %c0_i32_1 : i32, i32, i32
  }
  func.func @transform_1(%arg0: i32, %arg1: i32) -> (i32, i32, i32) {
    %c1_i32 = arith.constant 1 : i32
    %0 = arith.muli %arg0, %c1_i32 : i32
    %1 = arith.addi %0, %arg1 : i32
    %c0_i32 = arith.constant 0 : i32
    %2 = arith.minsi %1, %c0_i32 : i32
    %c0_i32_0 = arith.constant 0 : i32
    %c0_i32_1 = arith.constant 0 : i32
    %c0_i32_2 = arith.constant 0 : i32
    return %2, %c0_i32_0, %c0_i32_1 : i32, i32, i32
  }
  func.func @transform_2(%arg0: i32, %arg1: i32) -> (i32, i32, i32) {
    %c0_i32 = arith.constant 0 : i32
    %c0_i32_0 = arith.constant 0 : i32
    %c0_i32_1 = arith.constant 0 : i32
    return %arg0, %c0_i32, %c0_i32_0 : i32, i32, i32
  }
}

</mosaic_0001>

<bundles_post_ra>
// kernel: tpu_custom_call.1
= control target key start
LH: loop header
LB: loop body
LE: loop exit
PB: predicated region body
PF: predicated region fallthrough
CT: control target
= control target key end

     0   :  { %7 = vsyncpa [#allocation3], 0  ;;  %s198_s0 = inlined_call_operand.hbm [shape: f32[2,8,128], index: 0, kind: input, shape index: {}]   ;;  %s199_s1 = inlined_call_operand.hbm [shape: f32[2,8,128], index: 1, kind: input, shape index: {}]   ;;  %s200_s2 = inlined_call_operand.hbm [shape: f32[1,8,128], index: 2, kind: output, shape index: {}]  }
   0x1   :  { %8 = vsyncpa [#allocation6], 0 }
   0x2   :  { %9 = vsyncpa [#allocation4], 0  ;;  %s169_s9 = smov [#allocation2]  }
   0x3   :  { %s21_s10 = sshll.u32 %s169_s9, 4  ;;  %s22_s10 = int_to_ptr.vmem [resolvable:$true] %s21_s10 }
   0x4   :  { %s111_s11 = scalar_lea.vmem %s22_s10, 256  ;;  %p116_p1 = scmp.lt.s32.totalorder %s22_s10, %s22_s10 }
   0x5   :  { %p112_p0 = scmp.ne.s32.totalorder %s22_s10, %s111_s11  ;;  %p117_p2 = scmp.lt.s32.totalorder %s111_s11, %s111_s11 }
   0x7   :  { %p118_p3 = por %p117_p2, %p116_p1 }
   0x9   :  { %p119_p4 = pnand %p118_p3, %p112_p0 }
   0xb   :  { %122 = shalt.err (!%p119_p4)
}
   0xc   :  { %s170_s12 = smov 128   ;;  %s171_s13 = smov 8  }
   0xd   :  { %27 = dma.hbm_to_vmem [thread:$0]  %s198_s0, 256, %s22_s10, [#allocation3], %s170_s12, %s170_s12, %s171_s13  }
   0xe   :  { %s172_s16 = smov [#allocation5]  }
   0xf   :  { %s39_s17 = sshll.u32 %s172_s16, 4  ;;  %s40_s17 = int_to_ptr.vmem [resolvable:$true] %s39_s17 }
  0x10   :  { %s131_s18 = scalar_lea.vmem %s40_s17, 256  ;;  %p136_p6 = scmp.lt.s32.totalorder %s40_s17, %s40_s17 }
  0x11   :  { %p132_p5 = scmp.ne.s32.totalorder %s40_s17, %s131_s18  ;;  %p137_p7 = scmp.lt.s32.totalorder %s131_s18, %s131_s18 }
  0x13   :  { %p138_p8 = por %p137_p7, %p136_p6 }
  0x15   :  { %p139_p9 = pnand %p138_p8, %p132_p5 }
  0x17   :  { %142 = shalt.err (!%p139_p9)
}
  0x18   :  { %45 = dma.hbm_to_vmem [thread:$0]  %s199_s1, 256, %s40_s17, [#allocation6], %s170_s12, %s170_s12, %s171_s13  }
  0x19   :  { %163 = dma.done.wait [#allocation3], 256  }
  0x1a   :  { %164 = vsyncadd [#allocation3], 4294967040 }
  0x1b   :  { %165 = dma.done.wait [#allocation6], 256  }
  0x1c   :  { %166 = vsyncadd [#allocation6], 4294967040  ;;  %v65_v0 = vld [vmem:[#allocation2] sm:$0xff]  ;;  %v66_v1 = vld [vmem:[#allocation2 + $0x8] sm:$0xff]  ;;  %s173_s0 = smov [#allocation7]  }
  0x1d   :  { %v67_v2 = vld [vmem:[#allocation5] sm:$0xff]  ;;  %v68_v3 = vld [vmem:[#allocation5 + $0x8] sm:$0xff]  ;;  %s83_s21 = sshll.u32 %s173_s0, 4  ;;  %s84_s21 = int_to_ptr.vmem [resolvable:$true] %s83_s21 }
  0x1e   :  { %v69_v4 = vsub.f32 %v65_v0, %v67_v2  ;;  %v70_v5 = vsub.f32 %v66_v1, %v68_v3  ;;  %s143_s22 = scalar_lea.vmem %s84_s21, 128  ;;  %p148_p11 = scmp.lt.s32.totalorder %s84_s21, %s84_s21 }
  0x1f   :  { %p144_p10 = scmp.ne.s32.totalorder %s84_s21, %s143_s22  ;;  %p149_p12 = scmp.lt.s32.totalorder %s143_s22, %s143_s22 }
  0x20   :  { %v71_v6 = vmul.f32 %v69_v4, %v69_v4  ;;  %v72_v7 = vmul.f32 %v70_v5, %v70_v5 }
  0x21   :  { %p150_p13 = por %p149_p12, %p148_p11 }
  0x22   :  { %v74_v8 = vadd.f32 %v72_v7, %v71_v6 }
  0x23   :  { %p151_p0 = pnand %p150_p13, %p144_p10 }
  0x24   :  { %76 = vst [vmem:[#allocation7] sm:$0xff] %v74_v8 }
  0x25   :  { %154 = shalt.err (!%p151_p0)
}
  0x26   :  { %86 = dma.vmem_to_hbm [thread:$0]  %s84_s21, 128, %s200_s2, [#allocation4]  }
  0x27   :  { %167 = dma.done.wait [#allocation4], 128  }
  0x28   :  { %168 = vsyncadd [#allocation4], 4294967168 }
  0x29   :  { %90 = vsyncpa [#allocation3], 1 }
  0x2a   :  { %91 = vsyncpa [#allocation6], 1 }
  0x2b   :  { %92 = vsyncpa [#allocation4], 1 }

</bundles_post_ra>
